<compile_context>
chip_gen: v6e
topology: v6e:2x2x1
jax: 0.10.0
libtpu: 0.0.40
codegen_flags: <defaults>
</compile_context>

<pallas_src>
import math
from functools import partial

import jax
import jax.numpy as jnp
from jax import lax
from jax.experimental import pallas as pl
from jax.experimental.pallas import tpu as pltpu


def _mha_kernel(x_q_ref, x_kv_ref, mask_ref, w_in_t_ref, b_in_ref,
                w_out_t_ref, b_out_ref, o_ref, *, num_heads):
    """One grid step == (one batch element, one query tile).

    x_q_ref:   (1, TQ, E)  VMEM  query-tile slice of the input
    x_kv_ref:  (1, S,  E)  VMEM  full-sequence input (for K/V projection)
    mask_ref:  (1, 1,  S)  VMEM  f32, 1.0 = valid key, 0.0 = padding
    w_in_t_ref:(E, 3E)     VMEM  bf16, pre-transposed in_proj_weight
    b_in_ref:  (1, 3E)     VMEM  f32  in_proj_bias
    w_out_t_ref:(E, E)     VMEM  bf16, pre-transposed out_proj.weight
    b_out_ref: (1, E)      VMEM  f32  out_proj.bias
    o_ref:     (1, TQ, E)  VMEM
    """
    TQ = x_q_ref.shape[1]
    S = x_kv_ref.shape[1]
    E = x_q_ref.shape[2]
    Dh = E // num_heads
    scale = 1.0 / math.sqrt(Dh)

    w_in_t = w_in_t_ref[...]           # (E, 3E) bf16
    b_in = b_in_ref[...]               # (1, 3E) f32
    w_out_t = w_out_t_ref[...]         # (E, E)  bf16
    b_out = b_out_ref[...]             # (1, E)  f32

    xq = x_q_ref[0].astype(jnp.bfloat16)    # (TQ, E)
    xkv = x_kv_ref[0].astype(jnp.bfloat16)  # (S, E)

    # Q projection for this query tile; fused K/V projection for full sequence.
    q = jnp.dot(xq, w_in_t[:, 0:E],
                preferred_element_type=jnp.float32) + b_in[:, 0:E]      # (TQ,E)
    kv = jnp.dot(xkv, w_in_t[:, E:3 * E],
                 preferred_element_type=jnp.float32) + b_in[:, E:3 * E]  # (S,2E)
    k = kv[:, 0:E]
    v = kv[:, E:2 * E]

    # Loop-invariant additive key-padding bias (0 for valid, -1e30 for pad).
    # Note: a fully-padded row yields uniform attention here (torch yields NaN).
    key_valid = mask_ref[0]                          # (1, S)
    neg_bias = (1.0 - key_valid) * (-1e30)           # (1, S)

    q_bf = q.astype(jnp.bfloat16)
    k_bf = k.astype(jnp.bfloat16)
    v_bf = v.astype(jnp.bfloat16)

    # Accumulate the output projection per head (no concatenate of heads).
    out = jnp.zeros((TQ, E), jnp.float32) + b_out    # (TQ, E)
    for h in range(num_heads):
        lo = h * Dh
        hi = lo + Dh
        qh = q_bf[:, lo:hi]                          # (TQ, Dh)
        kh = k_bf[:, lo:hi]                          # (S,  Dh)
        vh = v_bf[:, lo:hi]                          # (S,  Dh)

        # scores = qh @ kh^T via dot_general (no materialized transpose).
        # NOTE: contraction K = Dh (< 256) under-fills the v6e/v7x MXU; acceptable
        # since the projection matmuls (K = E) dominate at moderate E.
        s = lax.dot_general(qh, kh, (((1,), (1,)), ((), ())),
                            preferred_element_type=jnp.float32)          # (TQ,S)
        s = s * scale + neg_bias

        m = jnp.max(s, axis=-1, keepdims=True)
        p = jnp.exp(s - m)                                               # (TQ,S)
        denom = jnp.sum(p, axis=-1, keepdims=True)                       # (TQ,1)

        # PV matmul on unnormalized probs; normalize the (TQ, Dh) result
        # (fewer multiplies than normalizing the (TQ, S) prob tile).
        oh = jnp.dot(p.astype(jnp.bfloat16), vh,
                     preferred_element_type=jnp.float32)                 # (TQ,Dh)
        oh = oh * pl.reciprocal(denom, approx=True)

        # Fold this head straight into the output projection.
        out = out + jnp.dot(oh.astype(jnp.bfloat16), w_out_t[lo:hi, :],
                            preferred_element_type=jnp.float32)          # (TQ,E)

    o_ref[0] = out.astype(o_ref.dtype)


def _pick_query_tile(S):
    """Largest 128-multiple tile that divides S; otherwise whole sequence."""
    for t in (512, 256, 128):
        if S % t == 0:
            return t
    return S


def multihead_attention(inputs, mask, params, *, num_heads):
    """inputs: (B, S, E) f32, mask: (B, S) with 1=valid, 0=pad."""
    B, S, E = inputs.shape
    assert E % num_heads == 0, "embed_dim must be divisible by num_heads"

    # Pre-transpose + bf16-cast weights once outside the grid loop.
    w_in_t = params["in_proj_weight"].T.astype(jnp.bfloat16)    # (E, 3E)
    w_out_t = params["out_proj_weight"].T.astype(jnp.bfloat16)  # (E, E)
    b_in = params["in_proj_bias"].astype(jnp.float32).reshape(1, 3 * E)
    b_out = params["out_proj_bias"].astype(jnp.float32).reshape(1, E)
    mask_f = mask.astype(jnp.float32).reshape(B, 1, S)

    TQ = _pick_query_tile(S)
    n_q_tiles = S // TQ

    kernel = partial(_mha_kernel, num_heads=num_heads)

    return pl.pallas_call(
        kernel,
        out_shape=jax.ShapeDtypeStruct((B, S, E), inputs.dtype),
        grid_spec=pltpu.PrefetchScalarGridSpec(
            num_scalar_prefetch=0,
            grid=(B, n_q_tiles),
            in_specs=[
                # query tile of the input
                pl.BlockSpec((1, TQ, E), lambda b, qi: (b, qi, 0)),
                # full-sequence input for K/V
                pl.BlockSpec((1, S, E), lambda b, qi: (b, 0, 0)),
                # key-padding mask
                pl.BlockSpec((1, 1, S), lambda b, qi: (b, 0, 0)),
                # weights / biases (constant blocks; invariant across the grid)
                pl.BlockSpec((E, 3 * E), lambda b, qi: (0, 0)),
                pl.BlockSpec((1, 3 * E), lambda b, qi: (0, 0)),
                pl.BlockSpec((E, E), lambda b, qi: (0, 0)),
                pl.BlockSpec((1, E), lambda b, qi: (0, 0)),
            ],
            out_specs=pl.BlockSpec((1, TQ, E), lambda b, qi: (b, qi, 0)),
        ),
        compiler_params=pltpu.CompilerParams(
            dimension_semantics=("parallel", "parallel"),
            vmem_limit_bytes=48 * 1024 * 1024,  # headroom below v7x's 64 MiB
        ),
    )(inputs, inputs, mask_f, w_in_t, b_in, w_out_t, b_out)


def _reference(inputs, mask, params, *, num_heads):
    """Pure-JAX f32 reference replicating torch.nn.MultiheadAttention (eval)."""
    B, S, E = inputs.shape
    Dh = E // num_heads
    qkv = jnp.einsum("bse,fe->bsf", inputs, params["in_proj_weight"],
                     preferred_element_type=jnp.float32) + params["in_proj_bias"]
    q, k, v = jnp.split(qkv, 3, axis=-1)
    q = q.reshape(B, S, num_heads, Dh).transpose(0, 2, 1, 3) / math.sqrt(Dh)
    k = k.reshape(B, S, num_heads, Dh).transpose(0, 2, 1, 3)
    v = v.reshape(B, S, num_heads, Dh).transpose(0, 2, 1, 3)
    s = jnp.einsum("bhqd,bhkd->bhqk", q, k, preferred_element_type=jnp.float32)
    key_mask = mask.astype(bool)[:, None, None, :]          # (B,1,1,S)
    s = jnp.where(key_mask, s, -jnp.inf)
    p = jax.nn.softmax(s, axis=-1)
    o = jnp.einsum("bhqk,bhkd->bhqd", p, v, preferred_element_type=jnp.float32)
    o = o.transpose(0, 2, 1, 3).reshape(B, S, E)
    return jnp.einsum("bse,fe->bsf", o, params["out_proj_weight"],
                      preferred_element_type=jnp.float32) + params["out_proj_bias"]


if __name__ == "__main__":
    # Small, module-consistent shapes.
    B, S, E, H = 2, 8, 32, 4

    key = jax.random.PRNGKey(0)
    k_x, k_w1, k_b1, k_w2, k_b2 = jax.random.split(key, 5)

    inputs = jax.random.normal(k_x, (B, S, E), dtype=jnp.float32)
    # 1 = valid token, 0 = padding (each batch keeps several valid keys).
    mask = jnp.concatenate(
        [jnp.ones((B, S - 2), jnp.int32), jnp.zeros((B, 2), jnp.int32)], axis=1)

    # Deterministic parameter init (xavier-ish scaling), torch shape conventions.
    params = {
        "in_proj_weight": jax.random.normal(k_w1, (3 * E, E), jnp.float32)
                          * (1.0 / math.sqrt(E)),
        "in_proj_bias": jax.random.normal(k_b1, (3 * E,), jnp.float32) * 0.02,
        "out_proj_weight": jax.random.normal(k_w2, (E, E), jnp.float32)
                           * (1.0 / math.sqrt(E)),
        "out_proj_bias": jax.random.normal(k_b2, (E,), jnp.float32) * 0.02,
    }

    out = multihead_attention(inputs, mask, params, num_heads=H)
    out = jax.block_until_ready(out)

    ref = _reference(inputs, mask, params, num_heads=H)
    assert out.shape == (B, S, E)
    # Kernel runs bf16-operand / f32-accum matmuls; compare against the f32
    # reference with tolerances sized for bf16 operand rounding.
    max_abs = float(jnp.max(jnp.abs(out - ref)))
    rel = float(jnp.linalg.norm(out - ref) / (jnp.linalg.norm(ref) + 1e-12))
    assert max_abs < 5e-2, f"max abs diff {max_abs} too large"
    assert rel < 2e-2, f"relative error {rel} too large"

    print("KERNEL_OK")
</pallas_src>

<mosaic_0001>
module attributes {stable_mosaic.version = 11 : i64} {
  func.func @_mha_kernel(%arg0: i32, %arg1: i32, %arg2: memref<1x8x32xf32, #tpu.memory_space<vmem>>, %arg3: memref<1x8x32xf32, #tpu.memory_space<vmem>>, %arg4: memref<1x1x8xf32, #tpu.memory_space<vmem>>, %arg5: memref<32x96xbf16, #tpu.memory_space<vmem>>, %arg6: memref<1x96xf32, #tpu.memory_space<vmem>>, %arg7: memref<32x32xbf16, #tpu.memory_space<vmem>>, %arg8: memref<1x32xf32, #tpu.memory_space<vmem>>, %arg9: memref<1x8x32xf32, #tpu.memory_space<vmem>>) attributes {dimension_semantics = [#tpu.dimension_semantics<parallel>, #tpu.dimension_semantics<parallel>], iteration_bounds = array<i64: 2, 1>, scalar_prefetch = 0 : i64, scratch_operands = 0 : i64, tpu.core_type = #tpu.core_type<tc>, window_params = [{transform_indices = @transform_0, window_bounds = array<i64: 1, 8, 32>}, {transform_indices = @transform_1, window_bounds = array<i64: 1, 8, 32>}, {transform_indices = @transform_2, window_bounds = array<i64: 1, 1, 8>}, {pipeline_mode = #tpu.pipeline_mode<synchronous>, transform_indices = @transform_3, window_bounds = array<i64: 32, 96>}, {pipeline_mode = #tpu.pipeline_mode<synchronous>, transform_indices = @transform_4, window_bounds = array<i64: 1, 96>}, {pipeline_mode = #tpu.pipeline_mode<synchronous>, transform_indices = @transform_5, window_bounds = array<i64: 32, 32>}, {pipeline_mode = #tpu.pipeline_mode<synchronous>, transform_indices = @transform_6, window_bounds = array<i64: 1, 32>}, {transform_indices = @transform_7, window_bounds = array<i64: 1, 8, 32>}]} {
    %c0 = arith.constant 0 : index
    %c0_0 = arith.constant 0 : index
    %0 = vector.load %arg5[%c0, %c0_0] : memref<32x96xbf16, #tpu.memory_space<vmem>>, vector<32x96xbf16>
    %c0_1 = arith.constant 0 : index
    %c0_2 = arith.constant 0 : index
    %1 = vector.load %arg6[%c0_1, %c0_2] : memref<1x96xf32, #tpu.memory_space<vmem>>, vector<1x96xf32>
    %c0_3 = arith.constant 0 : index
    %c0_4 = arith.constant 0 : index
    %2 = vector.load %arg7[%c0_3, %c0_4] : memref<32x32xbf16, #tpu.memory_space<vmem>>, vector<32x32xbf16>
    %c0_5 = arith.constant 0 : index
    %c0_6 = arith.constant 0 : index
    %3 = vector.load %arg8[%c0_5, %c0_6] : memref<1x32xf32, #tpu.memory_space<vmem>>, vector<1x32xf32>
    %c0_7 = arith.constant 0 : index
    %c0_8 = arith.constant 0 : index
    %c0_9 = arith.constant 0 : index
    %4 = vector.load %arg2[%c0_7, %c0_8, %c0_9] : memref<1x8x32xf32, #tpu.memory_space<vmem>>, vector<1x8x32xf32>
    %5 = vector.shape_cast %4 : vector<1x8x32xf32> to vector<8x32xf32>
    %6 = arith.truncf %5 : vector<8x32xf32> to vector<8x32xbf16>
    %c0_10 = arith.constant 0 : index
    %c0_11 = arith.constant 0 : index
    %c0_12 = arith.constant 0 : index
    %7 = vector.load %arg3[%c0_10, %c0_11, %c0_12] : memref<1x8x32xf32, #tpu.memory_space<vmem>>, vector<1x8x32xf32>
    %8 = vector.shape_cast %7 : vector<1x8x32xf32> to vector<8x32xf32>
    %9 = arith.truncf %8 : vector<8x32xf32> to vector<8x32xbf16>
    %10 = vector.extract_strided_slice %0 {offsets = [0, 0], sizes = [32, 32], strides = [1, 1]} : vector<32x96xbf16> to vector<32x32xbf16>
    %cst = arith.constant dense<0.000000e+00> : vector<8x32xf32>
    %11 = tpu.matmul %6, %10, %cst {dimension_numbers = #tpu.dot_dimension_numbers<[1], [0], [0], [1], [0, 0, 1, 1], [], []>} : vector<8x32xbf16>, vector<32x32xbf16>, vector<8x32xf32> -> vector<8x32xf32>
    %12 = vector.extract_strided_slice %1 {offsets = [0, 0], sizes = [1, 32], strides = [1, 1]} : vector<1x96xf32> to vector<1x32xf32>
    %13 = vector.broadcast %12 : vector<1x32xf32> to vector<8x32xf32>
    %14 = arith.addf %11, %13 : vector<8x32xf32>
    %15 = vector.extract_strided_slice %0 {offsets = [0, 32], sizes = [32, 64], strides = [1, 1]} : vector<32x96xbf16> to vector<32x64xbf16>
    %cst_13 = arith.constant dense<0.000000e+00> : vector<8x64xf32>
    %16 = tpu.matmul %9, %15, %cst_13 {dimension_numbers = #tpu.dot_dimension_numbers<[1], [0], [0], [1], [0, 0, 1, 1], [], []>} : vector<8x32xbf16>, vector<32x64xbf16>, vector<8x64xf32> -> vector<8x64xf32>
    %17 = vector.extract_strided_slice %1 {offsets = [0, 32], sizes = [1, 64], strides = [1, 1]} : vector<1x96xf32> to vector<1x64xf32>
    %18 = vector.broadcast %17 : vector<1x64xf32> to vector<8x64xf32>
    %19 = arith.addf %16, %18 : vector<8x64xf32>
    %20 = vector.extract_strided_slice %19 {offsets = [0, 0], sizes = [8, 32], strides = [1, 1]} : vector<8x64xf32> to vector<8x32xf32>
    %21 = vector.extract_strided_slice %19 {offsets = [0, 32], sizes = [8, 32], strides = [1, 1]} : vector<8x64xf32> to vector<8x32xf32>
    %c0_14 = arith.constant 0 : index
    %c0_15 = arith.constant 0 : index
    %c0_16 = arith.constant 0 : index
    %22 = vector.load %arg4[%c0_14, %c0_15, %c0_16] : memref<1x1x8xf32, #tpu.memory_space<vmem>>, vector<1x1x8xf32>
    %23 = vector.shape_cast %22 : vector<1x1x8xf32> to vector<1x8xf32>
    %cst_17 = arith.constant 1.000000e+00 : f32
    %24 = vector.broadcast %cst_17 : f32 to vector<1x8xf32>
    %25 = arith.subf %24, %23 : vector<1x8xf32>
    %cst_18 = arith.constant -1.000000e+30 : f32
    %26 = vector.broadcast %cst_18 : f32 to vector<1x8xf32>
    %27 = arith.mulf %25, %26 : vector<1x8xf32>
    %28 = arith.truncf %14 : vector<8x32xf32> to vector<8x32xbf16>
    %29 = arith.truncf %20 : vector<8x32xf32> to vector<8x32xbf16>
    %30 = arith.truncf %21 : vector<8x32xf32> to vector<8x32xbf16>
    %cst_19 = arith.constant 0.000000e+00 : f32
    %31 = vector.broadcast %cst_19 : f32 to vector<8x32xf32>
    %32 = vector.broadcast %3 : vector<1x32xf32> to vector<8x32xf32>
    %33 = arith.addf %31, %32 : vector<8x32xf32>
    %34 = vector.extract_strided_slice %28 {offsets = [0, 0], sizes = [8, 8], strides = [1, 1]} : vector<8x32xbf16> to vector<8x8xbf16>
    %35 = vector.extract_strided_slice %29 {offsets = [0, 0], sizes = [8, 8], strides = [1, 1]} : vector<8x32xbf16> to vector<8x8xbf16>
    %36 = vector.extract_strided_slice %30 {offsets = [0, 0], sizes = [8, 8], strides = [1, 1]} : vector<8x32xbf16> to vector<8x8xbf16>
    %cst_20 = arith.constant dense<0.000000e+00> : vector<8x8xf32>
    %37 = tpu.matmul %34, %35, %cst_20 {dimension_numbers = #tpu.dot_dimension_numbers<[1], [1], [0], [0], [0, 0, 1, 0], [], []>} : vector<8x8xbf16>, vector<8x8xbf16>, vector<8x8xf32> -> vector<8x8xf32>
    %cst_21 = arith.constant 0.353553385 : f32
    %38 = vector.broadcast %cst_21 : f32 to vector<8x8xf32>
    %39 = arith.mulf %37, %38 : vector<8x8xf32>
    %40 = vector.broadcast %27 : vector<1x8xf32> to vector<8x8xf32>
    %41 = arith.addf %39, %40 : vector<8x8xf32>
    %cst_22 = arith.constant dense<0xFF800000> : vector<8xf32>
    %42 = vector.multi_reduction <maximumf>, %41, %cst_22 [1] : vector<8x8xf32> to vector<8xf32>
    %43 = vector.shape_cast %42 : vector<8xf32> to vector<8x1xf32>
    %44 = vector.broadcast %43 : vector<8x1xf32> to vector<8x8xf32>
    %45 = arith.subf %41, %44 : vector<8x8xf32>
    %46 = math.exp %45 : vector<8x8xf32>
    %cst_23 = arith.constant dense<0.000000e+00> : vector<8xf32>
    %47 = vector.multi_reduction <add>, %46, %cst_23 [1] : vector<8x8xf32> to vector<8xf32>
    %48 = vector.shape_cast %47 : vector<8xf32> to vector<8x1xf32>
    %49 = arith.truncf %46 : vector<8x8xf32> to vector<8x8xbf16>
    %cst_24 = arith.constant dense<0.000000e+00> : vector<8x8xf32>
    %50 = tpu.matmul %49, %36, %cst_24 {dimension_numbers = #tpu.dot_dimension_numbers<[1], [0], [0], [1], [0, 0, 1, 1], [], []>} : vector<8x8xbf16>, vector<8x8xbf16>, vector<8x8xf32> -> vector<8x8xf32>
    %51 = tpu.reciprocal %48 {approx = true} : vector<8x1xf32> -> vector<8x1xf32>
    %52 = vector.broadcast %51 : vector<8x1xf32> to vector<8x8xf32>
    %53 = arith.mulf %50, %52 : vector<8x8xf32>
    %54 = arith.truncf %53 : vector<8x8xf32> to vector<8x8xbf16>
    %55 = vector.extract_strided_slice %2 {offsets = [0, 0], sizes = [8, 32], strides = [1, 1]} : vector<32x32xbf16> to vector<8x32xbf16>
    %cst_25 = arith.constant dense<0.000000e+00> : vector<8x32xf32>
    %56 = tpu.matmul %54, %55, %cst_25 {dimension_numbers = #tpu.dot_dimension_numbers<[1], [0], [0], [1], [0, 0, 1, 1], [], []>} : vector<8x8xbf16>, vector<8x32xbf16>, vector<8x32xf32> -> vector<8x32xf32>
    %57 = arith.addf %33, %56 : vector<8x32xf32>
    %58 = vector.extract_strided_slice %28 {offsets = [0, 8], sizes = [8, 8], strides = [1, 1]} : vector<8x32xbf16> to vector<8x8xbf16>
    %59 = vector.extract_strided_slice %29 {offsets = [0, 8], sizes = [8, 8], strides = [1, 1]} : vector<8x32xbf16> to vector<8x8xbf16>
    %60 = vector.extract_strided_slice %30 {offsets = [0, 8], sizes = [8, 8], strides = [1, 1]} : vector<8x32xbf16> to vector<8x8xbf16>
    %cst_26 = arith.constant dense<0.000000e+00> : vector<8x8xf32>
    %61 = tpu.matmul %58, %59, %cst_26 {dimension_numbers = #tpu.dot_dimension_numbers<[1], [1], [0], [0], [0, 0, 1, 0], [], []>} : vector<8x8xbf16>, vector<8x8xbf16>, vector<8x8xf32> -> vector<8x8xf32>
    %cst_27 = arith.constant 0.353553385 : f32
    %62 = vector.broadcast %cst_27 : f32 to vector<8x8xf32>
    %63 = arith.mulf %61, %62 : vector<8x8xf32>
    %64 = vector.broadcast %27 : vector<1x8xf32> to vector<8x8xf32>
    %65 = arith.addf %63, %64 : vector<8x8xf32>
    %cst_28 = arith.constant dense<0xFF800000> : vector<8xf32>
    %66 = vector.multi_reduction <maximumf>, %65, %cst_28 [1] : vector<8x8xf32> to vector<8xf32>
    %67 = vector.shape_cast %66 : vector<8xf32> to vector<8x1xf32>
    %68 = vector.broadcast %67 : vector<8x1xf32> to vector<8x8xf32>
    %69 = arith.subf %65, %68 : vector<8x8xf32>
    %70 = math.exp %69 : vector<8x8xf32>
    %cst_29 = arith.constant dense<0.000000e+00> : vector<8xf32>
    %71 = vector.multi_reduction <add>, %70, %cst_29 [1] : vector<8x8xf32> to vector<8xf32>
    %72 = vector.shape_cast %71 : vector<8xf32> to vector<8x1xf32>
    %73 = arith.truncf %70 : vector<8x8xf32> to vector<8x8xbf16>
    %cst_30 = arith.constant dense<0.000000e+00> : vector<8x8xf32>
    %74 = tpu.matmul %73, %60, %cst_30 {dimension_numbers = #tpu.dot_dimension_numbers<[1], [0], [0], [1], [0, 0, 1, 1], [], []>} : vector<8x8xbf16>, vector<8x8xbf16>, vector<8x8xf32> -> vector<8x8xf32>
    %75 = tpu.reciprocal %72 {approx = true} : vector<8x1xf32> -> vector<8x1xf32>
    %76 = vector.broadcast %75 : vector<8x1xf32> to vector<8x8xf32>
    %77 = arith.mulf %74, %76 : vector<8x8xf32>
    %78 = arith.truncf %77 : vector<8x8xf32> to vector<8x8xbf16>
    %79 = vector.extract_strided_slice %2 {offsets = [8, 0], sizes = [8, 32], strides = [1, 1]} : vector<32x32xbf16> to vector<8x32xbf16>
    %cst_31 = arith.constant dense<0.000000e+00> : vector<8x32xf32>
    %80 = tpu.matmul %78, %79, %cst_31 {dimension_numbers = #tpu.dot_dimension_numbers<[1], [0], [0], [1], [0, 0, 1, 1], [], []>} : vector<8x8xbf16>, vector<8x32xbf16>, vector<8x32xf32> -> vector<8x32xf32>
    %81 = arith.addf %57, %80 : vector<8x32xf32>
    %82 = vector.extract_strided_slice %28 {offsets = [0, 16], sizes = [8, 8], strides = [1, 1]} : vector<8x32xbf16> to vector<8x8xbf16>
    %83 = vector.extract_strided_slice %29 {offsets = [0, 16], sizes = [8, 8], strides = [1, 1]} : vector<8x32xbf16> to vector<8x8xbf16>
    %84 = vector.extract_strided_slice %30 {offsets = [0, 16], sizes = [8, 8], strides = [1, 1]} : vector<8x32xbf16> to vector<8x8xbf16>
    %cst_32 = arith.constant dense<0.000000e+00> : vector<8x8xf32>
    %85 = tpu.matmul %82, %83, %cst_32 {dimension_numbers = #tpu.dot_dimension_numbers<[1], [1], [0], [0], [0, 0, 1, 0], [], []>} : vector<8x8xbf16>, vector<8x8xbf16>, vector<8x8xf32> -> vector<8x8xf32>
    %cst_33 = arith.constant 0.353553385 : f32
    %86 = vector.broadcast %cst_33 : f32 to vector<8x8xf32>
    %87 = arith.mulf %85, %86 : vector<8x8xf32>
    %88 = vector.broadcast %27 : vector<1x8xf32> to vector<8x8xf32>
    %89 = arith.addf %87, %88 : vector<8x8xf32>
    %cst_34 = arith.constant dense<0xFF800000> : vector<8xf32>
    %90 = vector.multi_reduction <maximumf>, %89, %cst_34 [1] : vector<8x8xf32> to vector<8xf32>
    %91 = vector.shape_cast %90 : vector<8xf32> to vector<8x1xf32>
    %92 = vector.broadcast %91 : vector<8x1xf32> to vector<8x8xf32>
    %93 = arith.subf %89, %92 : vector<8x8xf32>
    %94 = math.exp %93 : vector<8x8xf32>
    %cst_35 = arith.constant dense<0.000000e+00> : vector<8xf32>
    %95 = vector.multi_reduction <add>, %94, %cst_35 [1] : vector<8x8xf32> to vector<8xf32>
    %96 = vector.shape_cast %95 : vector<8xf32> to vector<8x1xf32>
    %97 = arith.truncf %94 : vector<8x8xf32> to vector<8x8xbf16>
    %cst_36 = arith.constant dense<0.000000e+00> : vector<8x8xf32>
    %98 = tpu.matmul %97, %84, %cst_36 {dimension_numbers = #tpu.dot_dimension_numbers<[1], [0], [0], [1], [0, 0, 1, 1], [], []>} : vector<8x8xbf16>, vector<8x8xbf16>, vector<8x8xf32> -> vector<8x8xf32>
    %99 = tpu.reciprocal %96 {approx = true} : vector<8x1xf32> -> vector<8x1xf32>
    %100 = vector.broadcast %99 : vector<8x1xf32> to vector<8x8xf32>
    %101 = arith.mulf %98, %100 : vector<8x8xf32>
    %102 = arith.truncf %101 : vector<8x8xf32> to vector<8x8xbf16>
    %103 = vector.extract_strided_slice %2 {offsets = [16, 0], sizes = [8, 32], strides = [1, 1]} : vector<32x32xbf16> to vector<8x32xbf16>
    %cst_37 = arith.constant dense<0.000000e+00> : vector<8x32xf32>
    %104 = tpu.matmul %102, %103, %cst_37 {dimension_numbers = #tpu.dot_dimension_numbers<[1], [0], [0], [1], [0, 0, 1, 1], [], []>} : vector<8x8xbf16>, vector<8x32xbf16>, vector<8x32xf32> -> vector<8x32xf32>
    %105 = arith.addf %81, %104 : vector<8x32xf32>
    %106 = vector.extract_strided_slice %28 {offsets = [0, 24], sizes = [8, 8], strides = [1, 1]} : vector<8x32xbf16> to vector<8x8xbf16>
    %107 = vector.extract_strided_slice %29 {offsets = [0, 24], sizes = [8, 8], strides = [1, 1]} : vector<8x32xbf16> to vector<8x8xbf16>
    %108 = vector.extract_strided_slice %30 {offsets = [0, 24], sizes = [8, 8], strides = [1, 1]} : vector<8x32xbf16> to vector<8x8xbf16>
    %cst_38 = arith.constant dense<0.000000e+00> : vector<8x8xf32>
    %109 = tpu.matmul %106, %107, %cst_38 {dimension_numbers = #tpu.dot_dimension_numbers<[1], [1], [0], [0], [0, 0, 1, 0], [], []>} : vector<8x8xbf16>, vector<8x8xbf16>, vector<8x8xf32> -> vector<8x8xf32>
    %cst_39 = arith.constant 0.353553385 : f32
    %110 = vector.broadcast %cst_39 : f32 to vector<8x8xf32>
    %111 = arith.mulf %109, %110 : vector<8x8xf32>
    %112 = vector.broadcast %27 : vector<1x8xf32> to vector<8x8xf32>
    %113 = arith.addf %111, %112 : vector<8x8xf32>
    %cst_40 = arith.constant dense<0xFF800000> : vector<8xf32>
    %114 = vector.multi_reduction <maximumf>, %113, %cst_40 [1] : vector<8x8xf32> to vector<8xf32>
    %115 = vector.shape_cast %114 : vector<8xf32> to vector<8x1xf32>
    %116 = vector.broadcast %115 : vector<8x1xf32> to vector<8x8xf32>
    %117 = arith.subf %113, %116 : vector<8x8xf32>
    %118 = math.exp %117 : vector<8x8xf32>
    %cst_41 = arith.constant dense<0.000000e+00> : vector<8xf32>
    %119 = vector.multi_reduction <add>, %118, %cst_41 [1] : vector<8x8xf32> to vector<8xf32>
    %120 = vector.shape_cast %119 : vector<8xf32> to vector<8x1xf32>
    %121 = arith.truncf %118 : vector<8x8xf32> to vector<8x8xbf16>
    %cst_42 = arith.constant dense<0.000000e+00> : vector<8x8xf32>
    %122 = tpu.matmul %121, %108, %cst_42 {dimension_numbers = #tpu.dot_dimension_numbers<[1], [0], [0], [1], [0, 0, 1, 1], [], []>} : vector<8x8xbf16>, vector<8x8xbf16>, vector<8x8xf32> -> vector<8x8xf32>
    %123 = tpu.reciprocal %120 {approx = true} : vector<8x1xf32> -> vector<8x1xf32>
    %124 = vector.broadcast %123 : vector<8x1xf32> to vector<8x8xf32>
    %125 = arith.mulf %122, %124 : vector<8x8xf32>
    %126 = arith.truncf %125 : vector<8x8xf32> to vector<8x8xbf16>
    %127 = vector.extract_strided_slice %2 {offsets = [24, 0], sizes = [8, 32], strides = [1, 1]} : vector<32x32xbf16> to vector<8x32xbf16>
    %cst_43 = arith.constant dense<0.000000e+00> : vector<8x32xf32>
    %128 = tpu.matmul %126, %127, %cst_43 {dimension_numbers = #tpu.dot_dimension_numbers<[1], [0], [0], [1], [0, 0, 1, 1], [], []>} : vector<8x8xbf16>, vector<8x32xbf16>, vector<8x32xf32> -> vector<8x32xf32>
    %129 = arith.addf %105, %128 : vector<8x32xf32>
    %c0_44 = arith.constant 0 : index
    %c0_45 = arith.constant 0 : index
    %c0_46 = arith.constant 0 : index
    %130 = vector.load %arg9[%c0_44, %c0_45, %c0_46] : memref<1x8x32xf32, #tpu.memory_space<vmem>>, vector<1x8x32xf32>
    %131 = vector.shape_cast %130 : vector<1x8x32xf32> to vector<8x32xf32>
    %132 = vector.shape_cast %129 : vector<8x32xf32> to vector<1x8x32xf32>
    tpu.vector_store %arg9[%c0_44, %c0_45, %c0_46], %132 {strides = array<i32>} : memref<1x8x32xf32, #tpu.memory_space<vmem>>, vector<1x8x32xf32>,
    return
  }
  func.func @transform_0(%arg0: i32, %arg1: i32) -> (i32, i32, i32) {
    %c0_i32 = arith.constant 0 : i32
    %c0_i32_0 = arith.constant 0 : i32
    return %arg0, %arg1, %c0_i32 : i32, i32, i32
  }
  func.func @transform_1(%arg0: i32, %arg1: i32) -> (i32, i32, i32) {
    %c0_i32 = arith.constant 0 : i32
    %c0_i32_0 = arith.constant 0 : i32
    %c0_i32_1 = arith.constant 0 : i32
    return %arg0, %c0_i32, %c0_i32_0 : i32, i32, i32
  }
  func.func @transform_2(%arg0: i32, %arg1: i32) -> (i32, i32, i32) {
    %c0_i32 = arith.constant 0 : i32
    %c0_i32_0 = arith.constant 0 : i32
    %c0_i32_1 = arith.constant 0 : i32
    return %arg0, %c0_i32, %c0_i32_0 : i32, i32, i32
  }
  func.func @transform_3(%arg0: i32, %arg1: i32) -> (i32, i32) {
    %c0_i32 = arith.constant 0 : i32
    %c0_i32_0 = arith.constant 0 : i32
    %c0_i32_1 = arith.constant 0 : i32
    return %c0_i32, %c0_i32_0 : i32, i32
  }
  func.func @transform_4(%arg0: i32, %arg1: i32) -> (i32, i32) {
    %c0_i32 = arith.constant 0 : i32
    %c0_i32_0 = arith.constant 0 : i32
    %c0_i32_1 = arith.constant 0 : i32
    return %c0_i32, %c0_i32_0 : i32, i32
  }
  func.func @transform_5(%arg0: i32, %arg1: i32) -> (i32, i32) {
    %c0_i32 = arith.constant 0 : i32
    %c0_i32_0 = arith.constant 0 : i32
    %c0_i32_1 = arith.constant 0 : i32
    return %c0_i32, %c0_i32_0 : i32, i32
  }
  func.func @transform_6(%arg0: i32, %arg1: i32) -> (i32, i32) {
    %c0_i32 = arith.constant 0 : i32
    %c0_i32_0 = arith.constant 0 : i32
    %c0_i32_1 = arith.constant 0 : i32
    return %c0_i32, %c0_i32_0 : i32, i32
  }
  func.func @transform_7(%arg0: i32, %arg1: i32) -> (i32, i32, i32) {
    %c0_i32 = arith.constant 0 : i32
    %c0_i32_0 = arith.constant 0 : i32
    return %arg0, %arg1, %c0_i32 : i32, i32, i32
  }
}

</mosaic_0001>

<bundles_post_ra>
// kernel: tpu_custom_call.1
= control target key start
LH: loop header
LB: loop body
LE: loop exit
PB: predicated region body
PF: predicated region fallthrough
CT: control target
= control target key end

     0   :  { %s2187_s0 = inlined_call_operand.hbm [shape: f32[2,8,32], index: 0, kind: input, shape index: {}]   ;;  %s2188_s1 = inlined_call_operand.hbm [shape: f32[2,8,32], index: 1, kind: input, shape index: {}]   ;;  %s2189_s2 = inlined_call_operand.vmem [shape: f32[2,1,8], index: 2, kind: input, shape index: {}]   ;;  %s2190_s3 = inlined_call_operand.hbm [shape: bf16[32,96], index: 3, kind: input, shape index: {}]   ;;  %s2191_s4 = inlined_call_operand.vmem [shape: f32[1,96], index: 4, kind: input, shape index: {}]   ;;  %s2192_s5 = inlined_call_operand.hbm [shape: bf16[32,32], index: 5, kind: input, shape index: {}]   ;;  %s2193_s6 = inlined_call_operand.vmem [shape: f32[1,32], index: 6, kind: input, shape index: {}]   ;;  %s2194_s7 = inlined_call_operand.hbm [shape: f32[2,8,32], index: 7, kind: output, shape index: {}]  }
   0x1   :  { %2197 = sst [smem:[#allocation17_spill]] %s2187_s0 }
   0x2   :  { %2198 = sst [smem:[#allocation18_spill]] %s2188_s1 }
   0x3   :  { %2199 = sst [smem:[#allocation19_spill]] %s2190_s3 }
   0x4   :  { %2200 = sst [smem:[#allocation20_spill]] %s2192_s5 }
   0x5   :  { %12 = vsyncpa [#allocation3], 0 }
   0x6   :  { %14 = vsyncpa [#allocation3 + $0x1], 0 }
   0x7   :  { %15 = vsyncpa [#allocation6], 0 }
   0x8   :  { %17 = vsyncpa [#allocation6 + $0x1], 0 }
   0x9   :  { %18 = vsyncpa [#allocation9], 0 }
   0xa   :  { %19 = vsyncpa [#allocation4], 0 }
   0xb   :  { %21 = vsyncpa [#allocation4 + $0x1], 0  ;;  %s1856_s24 = smov 0   ;;  %s1858_s25 = smov 0  }
   0xc   :  { %s1860_s26 = smov 0   ;;  %s1862_s27 = smov 0  }
   0xd   :  { %s1864_s28 = smov 0   ;;  %s1866_s29 = smov 0  }
   0xe LB: > { %s1887_s30 = sadd.s32 4294967295, %s1798_s29   ;;  %s1326_s8 = sadd.s32 4294967294, %s1798_s29   ;;  %s1798_s29 = sphi %s1866_s29, %s27_s29   ;;  %s1794_s28 = sphi %s1864_s28, %s2224_s28   ;;  %s1790_s27 = sphi %s1862_s27, %s2223_s27   ;;  %s1786_s26 = sphi %s1860_s26, %s2222_s26   ;;  %s1782_s25 = sphi %s1858_s25, %s2221_s25   ;;  %s1778_s24 = sphi %s1856_s24, %s2220_s24  }
   0xf   : > { %p61_p0 = scmp.ne.s32.totalorder %s1782_s25, %s1778_s24  ;;  %p2195_p1 = scmp.eq.s32.totalorder %s1887_s30, 0 }
  0x10   : > { %p229_p3 = scmp.eq.s32.totalorder %s1326_s8, 1  ;;  %p1327_p5 = scmp.ge.s32.totalorder %s1798_s29, 1 }
  0x11   : > { %p1896_p4 = por %p2195_p1, %p61_p0  ;;  %p236_p7 = scmp.lt.s32.totalorder %s1798_s29, 3 }
  0x12   : > { %p1901_p6 = por %p229_p3, %p61_p0  ;;  %s1800_s12 = smov [#allocation7]  }
  0x13   : > { %p1906_p8 = pnand %p1327_p5, %p236_p7  ;;  %s248_s13 = sshll.u32 %s1800_s12, 4  ;;  %s249_s13 = int_to_ptr.vmem [resolvable:$true] %s248_s13 }
  0x14   : > { %s2202_s10 = scalar_select %p1901_p6, 1, 0 }
  0x15   : > { %p1495_p9 = pneg %p1906_p8  ;;  %s1801_s15 = smov [#allocation8]  }
  0x16   : > { %s264_s16 = sshll.u32 %s1801_s15, 4  ;;  %s1609_s17 = scalar_lea.vmem %s249_s13, 256  ;;  %s265_s16 = int_to_ptr.vmem [resolvable:$true] %s264_s16 }
  0x17   : > { %p1915_p11 = pnand %p1495_p9, %p2195_p1  ;;  %p1610_p13 = scmp.ne.s32.totalorder %s249_s13, %s1609_s17 }
  0x18   : > { %p1617_p5 = scmp.lt.s32.totalorder %s249_s13, %s249_s13  ;;  %p1618_p7 = scmp.lt.s32.totalorder %s1609_s17, %s1609_s17 }
  0x19   : > { %p1600_p12 = pneg %p1915_p11 }
  0x1a   : > { %p1619_p10 = por %p1618_p7, %p1617_p5 }
  0x1b   : > { %p1612_p0 = pnand %p1610_p13, %p1600_p12 }
  0x1d   : > { %p1613_p3 = pneg %p1612_p0 }
  0x1f   : > { %p1620_p9 = pnand %p1619_p10, %p1613_p3 }
  0x21   : > { %1623 = shalt.err (!%p1620_p9)
}
  0x22   : > { %s1802_s18 = smov 64   ;;  %s1803_s19 = smov 4  }
  0x23   : > { %s2205_s3 = sld [smem:[#allocation19_spill]]  ;;  %s1635_s22 = scalar_lea.vmem %s265_s16, 256 }
  0x24   : > { %p1636_p1 = scmp.ne.s32.totalorder %s265_s16, %s1635_s22  ;;  %p1643_p2 = scmp.lt.s32.totalorder %s265_s16, %s265_s16 }
  0x25   : > { %p1644_p6 = scmp.lt.s32.totalorder %s1635_s22, %s1635_s22 }
  0x26   : > { %p1638_p13 = pnand %p1636_p1, %p1600_p12 }
  0x27   : > { %p1645_p5 = por %p1644_p6, %p1643_p2 }
  0x28   : > { %p1639_p0 = pneg %p1638_p13 }
  0x29   : > { %1498 = dma.hbm_to_vmem [thread:$0]  (!%p1915_p11), %s2205_s3, 256, %s249_s13, [#allocation6], %s1802_s18, %s1802_s18, %s1803_s19  }
  0x2a   : > { %p1646_p10 = pnand %p1645_p5, %p1639_p0 }
  0x2c   : > { %1649 = shalt.err (!%p1646_p10)
}
  0x2d   : > { %s2206_s5 = sld [smem:[#allocation20_spill]]  ;;  %s39_s12 = sadd.s32 1, %s1794_s28 }
  0x2e   : > { %s48_s13 = sadd.s32 1, %s1786_s26  ;;  %p41_p1 = scmp.ge.s32.totalorder %s39_s12, 2 }
  0x2f   : > { %p55_p2 = scmp.ne.s32.totalorder %s1786_s26, %s1782_s25  ;;  %p56_p6 = scmp.eq.s32.totalorder %s1798_s29, 0 }
  0x30   : > { %p1515_p12 = scmp.lt.s32.totalorder %s1798_s29, 2  ;;  %s2226_s12 = smov (%p41_p1, %s39_s12), 0 }
  0x31   : > { %2207 = sst [smem:[#allocation16_spill]] %s2226_s12  ;;  %p57_p3 = por %p56_p6, %p55_p2 }
  0x32   : > { %p2208_p7 = scmp.eq.s32.totalorder %s1887_s30, 1  ;;  %s43_s15 = ssub.s32 %s1794_s28, %s2226_s12 }
  0x33   : > { %1501 = dma.hbm_to_vmem [thread:$0]  (!%p1915_p11), %s2206_s5, 256, %s265_s16, [#allocation9], %s1802_s18, %s1802_s18, %s1803_s19  }
  0x34   : > { %p1947_p9 = por %p2208_p7, %p55_p2  ;;  %s281_s17 = sand.u32 1, %s1786_s26  }
  0x35   : > { %p46_p13 = scmp.eq.s32.totalorder %s43_s15, 0  ;;  %s1331_s16 = sshll.u32 %s281_s17, 3 }
  0x36   : > { %s1332_s18 = sshll.u32 %s1794_s28, 7  ;;  %s2210_s0 = sld [smem:[#allocation17_spill]] }
  0x37   : > { %s1956_s19 = scalar_select %p46_p13, %s1786_s26, %s48_s13  }
  0x38   : > { %s285_s23 = scalar_lea.vmem [#allocation2], %s1331_s16  ;;  %p1963_p11 = pnand %p1515_p12, %p57_p3 }
  0x39   : > { %s293_s8 = sshll.u32 %s285_s23, 4  ;;  %s2212_s1 = sld [smem:[#allocation18_spill]]  ;;  %s294_s8 = int_to_ptr.vmem [resolvable:$true] %s293_s8 }
  0x3a   : > { %s282_s13 = scalar_lea.sflag [#allocation3], %s281_s17  ;;  %p1652_p0 = pneg %p1963_p11 }
  0x3b   : > { %s1663_s20 = scalar_lea.vmem %s294_s8, 128  ;;  %s1804_s21 = smov [#allocation2]  }
  0x3c   : > { %s291_s22 = scalar_lea.hbm %s2210_s0, %s1332_s18  ;;  %p1664_p5 = scmp.ne.s32.totalorder %s294_s8, %s1663_s20 }
  0x3d   : > { %s1668_s23 = sshll.u32 %s1804_s21, 4  ;;  %s1669_s23 = int_to_ptr.vmem [resolvable:$false] %s1668_s23 }
  0x3e   : > { %p1666_p10 = pnand %p1664_p5, %p1652_p0  ;;  %s1670_s0 = scalar_lea.vmem %s1669_s23, 256 }
  0x3f   : > { %s1970_s12 = scalar_lea.hbm %s2212_s1, %s1332_s18  ;;  %p1671_p2 = scmp.lt.s32.totalorder %s294_s8, %s1669_s23 }
  0x40   : > { %p1667_p1 = pneg %p1666_p10  ;;  %p1672_p6 = scmp.lt.s32.totalorder %s1670_s0, %s1663_s20 }
  0x42   : > { %p1673_p12 = por %p1672_p6, %p1671_p2 }
  0x44   : > { %p1674_p3 = pnand %p1673_p12, %p1667_p1 }
  0x46   : > { %1677 = shalt.err (!%p1674_p3)
}
  0x47   : > { %1505 = dma.hbm_to_vmem [thread:$0]  (!%p1963_p11), %s291_s22, 128, %s294_s8, %s282_s13  }
  0x48   : > { %s300_s5 = sand.u32 1, %s1798_s29   ;;  %s304_s17 = scalar_lea.vmem [#allocation5], %s1331_s16 }
  0x49   : > { %s311_s18 = sshll.u32 %s304_s17, 4  ;;  %s301_s15 = scalar_lea.sflag [#allocation6], %s300_s5  ;;  %s312_s18 = int_to_ptr.vmem [resolvable:$true] %s311_s18 }
  0x4a   : > { %s1691_s1 = scalar_lea.vmem %s312_s18, 128  ;;  %s1805_s0 = smov [#allocation5]  }
  0x4b   : > { %p1692_p7 = scmp.ne.s32.totalorder %s312_s18, %s1691_s1  ;;  %s1696_s20 = sshll.u32 %s1805_s0, 4  ;;  %s1697_s20 = int_to_ptr.vmem [resolvable:$false] %s1696_s20 }
  0x4c   : > { %s1698_s21 = scalar_lea.vmem %s1697_s20, 256  ;;  %p1699_p10 = scmp.lt.s32.totalorder %s312_s18, %s1697_s20 }
  0x4d   : > { %p1694_p13 = pnand %p1692_p7, %p1652_p0  ;;  %p1700_p1 = scmp.lt.s32.totalorder %s1698_s21, %s1691_s1 }
  0x4f   : > { %p1695_p5 = pneg %p1694_p13  ;;  %p1701_p2 = por %p1700_p1, %p1699_p10 }
  0x51   : > { %p1702_p6 = pnand %p1701_p2, %p1695_p5 }
  0x53   : > { %1705 = shalt.err (!%p1702_p6)
}
  0x54   : > { %1508 = dma.hbm_to_vmem [thread:$0]  (!%p1963_p11), %s1970_s12, 128, %s312_s18, %s301_s15  }
  0x55   : > { %326 = sbr.rel (%p1906_p8) target bundleno = 2284 (0x8ec), region = 48  ;;  %s1989_s16 = sand.u32 (!%p1906_p8), 1, %s1782_s25  }
  0x56   : > { %s1992_s22 = sshll.u32 (!%p1906_p8), %s1989_s16, 3  ;;  %s329_s1 = scalar_lea.sflag (!%p1906_p8), [#allocation3], %s1989_s16 }
  0x57   : > { %s332_s8 = scalar_lea.vmem (!%p1906_p8), [#allocation2], %s1992_s22 }
  0x5a   : > { %1757 = dma.done.wait (%p1896_p4), %s329_s1, 128  }
  0x5b   : > { %1759 = vsyncadd (%p1896_p4), %s329_s1, 4294967168  ;;  %s337_s3 = sand.u32 1, %s1887_s30   ;;  %s341_s12 = scalar_lea.vmem [#allocation5], %s1992_s22 }
  0x5c   : > { %s338_s11 = scalar_lea.sflag [#allocation6], %s337_s3 }
  0x5d   : > { %1761 = dma.done.wait (%p1896_p4), %s338_s11, 128  }
  0x5e   : > { %1763 = vsyncadd (%p1896_p4), %s338_s11, 4294967168  ;;  %p2213_p8 = scmp.eq.s32.totalorder %s1887_s30, 0 }
  0x60   : > { %1765 = dma.done.wait (%p2213_p8), [#allocation6], 256   ;;  %p2214_p11 = pmov %p2213_p8 }
  0x61   : > { %p2215_p0 = pmov %p2213_p8 }
  0x62   : > { %1767 = vsyncadd (%p2214_p11), [#allocation6], 4294967040 }
  0x63   : > { %1769 = dma.done.wait (%p2215_p0), [#allocation9], 256   ;;  %p2216_p12 = pmov %p2215_p0 }
  0x64   : > { %v1806_v0 = vmov 0.0   ;;  %vm1807_vm0 = vmmov 0   ;;  %v1580_v1 = vld [vmem:[#allocation7 + $0x8] sm:$0xff]   ;;  %s1808_s9 = smov 96   ;;  %v1581_v2 = vld [vmem:[#allocation7] sm:$0xff]   ;;  %vm424_vm1 = vcmask 261120   ;;  %v581_v26 = vlaneseq }
  0x65   : > { %1771 = vsyncadd (%p2216_p12), [#allocation9], 4294967040  ;;  %1401 = vmatprep.subr.bf16.mxu1 %v1806_v0  ;;  %1393 = vmatprep.subr.bf16.mxu0 %v1806_v0  ;;  %v402_v3 = vld [vmem:[%s332_s8] sm:$0xff]  ;;  %v404_v7 = vld [vmem:[%s341_s12] sm:$0xff]  ;;  %vm532_vm2 = vcmask 64512   ;;  %s1809_s23 = smov 120  }
  0x66   : > { %1405 = vmatprep.mubr.msk.bf16.mxu1 %vm1807_vm0, %v1806_v0  ;;  %1397 = vmatprep.mubr.msk.bf16.mxu0 %vm1807_vm0, %v1806_v0  ;;  %v1341_v4 = vld [vmem:[%s2191_s4] ss:$0 sm:$0xff]  ;;  %v403_v5 = vpack.c.bf16 %v402_v3, %v402_v3  ;;  %v405_v9 = vpack.c.bf16 %v404_v7, %v404_v7  ;;  %vm603_vm3 = vcmask 1043456   ;;  %p388_p4 = scmp.lt.s32.totalorder %s1790_s27, 1  ;;  %v582_v29 = vshrl.u32 %v581_v26, 7  ;;  %s1810_s0 = smov 112  }
  0x67   : > { %470 = vrot.lane.b32.xlu0 %v1580_v1, %s1808_s9  ;;  %1394 = vmatpush3.bf16.msra.mxu0 %v1580_v1  ;;  %v397_v49 = vld [vmem:[#allocation8] sm:$0xf]  ;;  %s1811_s20 = smov 88   ;;  %s1812_s21 = smov 80  }
  0x68   : > { %1395 = vmatprep.subr.bf16.mxu0 %v1806_v0  ;;  %474 = vrot.lane.b32.xlu1 %v1341_v4, %s1808_s9  ;;  %s389_s5 = scalar_select %p388_p4, %s1790_s27, 1  ;;  %v583_v31 = vsub.s32 0, %v582_v29  ;;  %v654_v50 = vsel %vm603_vm3, %v397_v49, 0 }
  0x69   : > { %s1813_s1 = smov 104   ;;  %s1814_s11 = smov 72  }
  0x6a   : > { %s390_s15 = scalar_lea.vmem %s2189_s2, %s389_s5  ;;  %s1360_s12 = sshll.u32 %s1790_s27, 7 }
  0x6b   : > { %468 = vrot.lane.b32.xlu0 %v1581_v2, %s1808_s9  ;;  %1396 = vmatpush3.bf16.msra.mxu0 %v1581_v2  ;;  %v520_v27 = vld [vmem:[%s390_s15] sm:$0x1]  ;;  %s2138_s5 = scalar_lea.hbm %s2194_s7, %s1360_s12  ;;  %s1180_s17 = scalar_lea.sflag [#allocation4], %s1989_s16 }
  0x6c   : > { %1409 = vmatprep.subr.bf16.mxu0 %v1806_v0  ;;  %v521_v28 = vsub.f32 1.0, %v520_v27 }
  0x6e   : > { %1398 = vmatmul.mubr.msk.bf16.vlgmr.msra.gmra.mxu0 %vm424_vm1, %v403_v5  ;;  %v522_v30 = vmul.f32 -1e+30, %v521_v28 }
  0x6f   : > { %1411 = vmatprep.mubr.msk.bf16.mxu0 %vm1807_vm0, %v1806_v0 }
  0x70   : > { %v2060_v32 = vrot.slane %v522_v30, %v583_v31 }
  0xd9   : > { %v471_v6 = vpop.permute.xlu0 %470 }
  0xda   : > { %1402 = vmatpush3.bf16.msra.mxu1 %v471_v6  ;;  %v475_v14 = vpop.permute.xlu1 %474 }
  0xdb   : > { %1403 = vmatprep.subr.bf16.mxu1 %v1806_v0 }
  0xdd   : > { %v469_v8 = vpop.permute.xlu0 %468 }
  0xde   : > { %1404 = vmatpush3.bf16.msra.mxu1 %v469_v8 }
  0xdf   : > { %1415 = vmatprep.subr.bf16.mxu1 %v1806_v0 }
  0xe1   : > { %1406 = vmatmul.mubr.msk.bf16.vlgmr.msra.gmra.mxu1 %vm424_vm1, %v405_v9 }
  0xe2   : > { %1417 = vmatprep.mubr.msk.bf16.mxu1 %vm1807_vm0, %v1806_v0 }
 0x12e   : > { %v462_v10 = vpop.f32.mrf.mxu0 }
 0x12f   : > { %v463_v20 = vadd.f32 %v1341_v4, %v462_v10 }
 0x130   : > { %v1399_v11 = vpop.f32.mrf.mxu0 }
 0x131   : > { %v2045_v23 = vpack.c.bf16 %v463_v20, %v463_v20 }
 0x132   : > { %v465_v12 = vpop.f32.mrf.mxu0 }
 0x134   : > { %v1400_v13 = vpop.f32.mrf.mxu0 }
 0x1a1   : > { %v514_v15 = vpop.f32.mrf.mxu1 }
 0x1a2   : > { %v515_v16 = vadd.f32 %v514_v15, %v475_v14 }
 0x1a3   : > { %v1407_v17 = vpop.f32.mrf.mxu1 }
 0x1a4   : > { %v2038_v18 = vpack.c.bf16 %v515_v16, %v515_v16 }
 0x1a5   : > { %v517_v19 = vpop.f32.mrf.mxu1 }
 0x1a6   : > { %598 = vrot.lane.b32.xlu0 %v2038_v18, %s1808_s9  ;;  %v537_v21 = vsel %vm532_vm2, %v2038_v18, 0  ;;  %v398_v19 = vld [vmem:[#allocation8 + $0x4] sm:$0xf]  ;;  %s387_s9 = scalar_lea.vmem [#allocation10], %s1992_s22  ;;  %s1815_s22 = smov [#allocation10]  }
 0x1a7   : > { %v1408_v22 = vpop.f32.mrf.mxu1  ;;  %1410 = vmatpush3.bf16.xpose.msra.mxu0 %v537_v21  ;;  %v815_v20 = vsel %vm603_vm3, %v398_v19, 0  ;;  %s1194_s30 = sshll.u32 %s387_s9, 4  ;;  %s1710_s18 = sshll.u32 %s1815_s22, 4  ;;  %s2140_s30 = int_to_ptr.vmem [resolvable:$true] %s1194_s30  ;;  %s1711_s18 = int_to_ptr.vmem [resolvable:$false] %s1710_s18 }
 0x1a8   : > { %1421 = vmatprep.subr.bf16.mxu0 %v1806_v0  ;;  %s1706_s27 = scalar_lea.vmem %s2140_s30, 128  ;;  %s1712_s15 = scalar_lea.vmem %s1711_s18, 256 }
 0x1a9   : > { %p1707_p3 = scmp.ne.s32.totalorder %s2140_s30, %s1706_s27  ;;  %p1713_p5 = scmp.lt.s32.totalorder %s2140_s30, %s1711_s18 }
 0x1aa   : > { %700 = vrot.lane.b32.xlu0 %v2038_v18, %s1809_s23  ;;  %p1714_p10 = scmp.lt.s32.totalorder %s1712_s15, %s1706_s27 }
 0x1ab   : > { %p1708_p7 = pnand %p1707_p3, %p1947_p9 }
 0x1ac   : > { %p1715_p1 = por %p1714_p10, %p1713_p5 }
 0x1ad   : > { %p1709_p13 = pneg %p1708_p7 }
 0x1ae   : > { %1412 = vmatmul.mubr.msk.bf16.vlgmr.msra.gmra.mxu0 %vm532_vm2, %v2045_v23  ;;  %698 = vrot.lane.b32.xlu0 %v2045_v23, %s1809_s23 }
 0x1af   : > { %1423 = vmatprep.mubr.msk.bf16.mxu0 %vm1807_vm0, %v1806_v0  ;;  %1422 = vmatpush3.bf16.msra.mxu0 %v654_v50  ;;  %p1716_p2 = pnand %p1715_p1, %p1709_p13 }
 0x1b0   : > { %1433 = vmatprep.subr.bf16.mxu0 %v1806_v0 }
 0x218   : > { %v599_v24 = vpop.permute.xlu0 %598 }
 0x219   : > { %v605_v25 = vsel %vm603_vm3, %v599_v24, 0 }
 0x21a   : > { %1416 = vmatpush3.bf16.msra.mxu1 %v605_v25 }
 0x21b   : > { %1427 = vmatprep.subr.bf16.mxu1 %v1806_v0 }
 0x21c   : > { %v701_v44 = vpop.permute.xlu0 %700 }
 0x21d   : > { %v706_v47 = vsel %vm532_vm2, %v701_v44, 0 }
 0x220   : > { %v699_v48 = vpop.permute.xlu0 %698 }
 0x26e   : > { %v573_v33 = vpop.f32.mrf.mxu0 }
 0x26f   : > { %v579_v34 = vmul.f32 0.35355338, %v573_v33 }
 0x270   : > { %v1413_v35 = vpop.f32.mrf.mxu0 }
 0x271   : > { %v586_v36 = vadd.f32 %v2060_v32, %v579_v34 }
 0x272   : > { %v576_v37 = vpop.f32.mrf.mxu0 }
 0x273   : > { %v587_v38 = vsel %vm532_vm2, %v586_v36, -inf }
 0x274   : > { %588 = vmax.xlane.f32.xlu1 %v587_v38  ;;  %v1414_v39 = vpop.f32.mrf.mxu0 }
 0x2fd   : > { %v589_v40 = vpop.xlane.xlu1 %588 }
 0x2fe   : > { %v590_v41 = vsub.f32 %v586_v36, %v589_v40 }
 0x300   : > { %v591_v42 = vmul.f32 1.442695, %v590_v41 }
 0x302   : > { %1582 = vpow2.f32 %v591_v42 }
 0x30f   : > { %v1583_v43 = vpop.eup %1582 }
 0x310   : > { %v593_v45 = vsel %vm532_vm2, %v1583_v43, 0.0  ;;  %v596_v46 = vpack.c.bf16 %v1583_v43, %v1583_v43 }
 0x311   : > { %594 = vadd.xlane.f32.xlu0 %v593_v45 }
 0x312   : > { %1418 = vmatmul.mubr.msk.bf16.vlgmr.msra.gmra.mxu1 %vm532_vm2, %v596_v46 }
 0x313   : > { %1428 = vmatpush3.bf16.xpose.msra.mxu1 %v706_v47  ;;  %1429 = vmatprep.mubr.msk.bf16.mxu1 %vm1807_vm0, %v1806_v0 }
 0x314   : > { %1439 = vmatprep.subr.bf16.mxu1 %v1806_v0 }
 0x31a   : > { %1430 = vmatmul.mubr.msk.bf16.vlgmr.msra.gmra.mxu1 %vm532_vm2, %v699_v48  ;;  %v1346_v48 = vld [vmem:[%s2193_s6] ss:$0 sm:$0xff] }
 0x31b   : > { %1441 = vmatprep.mubr.msk.bf16.mxu1 %vm1807_vm0, %v1806_v0  ;;  %1440 = vmatpush3.bf16.msra.mxu1 %v815_v20 }
 0x31c   : > { %1451 = vmatprep.subr.bf16.mxu1 %v1806_v0 }
 0x327   : > { %860 = vrot.lane.b32.xlu0 %v2038_v18, %s1810_s0 }
 0x39a   : > { %v595_v51 = vpop.xlane.xlu0 %594 }
 0x39b   : > { %1584 = vrcp.f32 %v595_v51 }
 0x39e   : > { %v861_v9 = vpop.permute.xlu0 %860 }
 0x39f   : > { %v866_v12 = vsel %vm532_vm2, %v861_v9, 0 }
 0x3a8   : > { %v1585_v52 = vpop.eup %1584 }
 0x3d2   : > { %v641_v53 = vpop.f32.mrf.mxu1 }
 0x3d3   : > { %v648_v54 = vmul.f32 %v1585_v52, %v641_v53 }
 0x3d4   : > { %v1419_v55 = vpop.f32.mrf.mxu1 }
 0x3d5   : > { %v649_v56 = vpack.c.bf16 %v648_v54, %v648_v54  ;;  %v399_v55 = vld [vmem:[#allocation8 + $0x8] sm:$0xf] }
 0x3d6   : > { %v644_v57 = vpop.f32.mrf.mxu1 }
 0x3d7   : > { %1424 = vmatmul.mubr.msk.bf16.vlgmr.msra.gmra.mxu0 %vm532_vm2, %v649_v56  ;;  %v975_v56 = vsel %vm603_vm3, %v399_v55, 0 }
 0x3d8   : > { %v1420_v58 = vpop.f32.mrf.mxu1  ;;  %1435 = vmatprep.mubr.msk.bf16.mxu0 %vm1807_vm0, %v1806_v0 }
 0x3da   : > { %v742_v59 = vpop.f32.mrf.mxu1 }
 0x3db   : > { %v748_v60 = vmul.f32 0.35355338, %v742_v59 }
 0x3dc   : > { %v1431_v61 = vpop.f32.mrf.mxu1 }
 0x3dd   : > { %v749_v62 = vadd.f32 %v748_v60, %v2060_v32 }
 0x3de   : > { %v745_v63 = vpop.f32.mrf.mxu1 }
 0x3df   : > { %v750_v1 = vsel %vm532_vm2, %v749_v62, -inf }
 0x3e0   : > { %751 = vmax.xlane.f32.xlu1 %v750_v1  ;;  %v1432_v2 = vpop.f32.mrf.mxu1 }
 0x3f1   : > { %760 = vrot.lane.b32.xlu1 %v2038_v18, %s1811_s20 }
 0x3f5   : > { %858 = vrot.lane.b32.xlu1 %v2045_v23, %s1810_s0 }
 0x469   : > { %v752_v3 = vpop.xlane.xlu1 %751 }
 0x46a   : > { %v753_v4 = vsub.f32 %v749_v62, %v752_v3 }
 0x46c   : > { %v754_v5 = vmul.f32 1.442695, %v753_v4 }
 0x46d   : > { %v761_v6 = vpop.permute.xlu1 %760 }
 0x46e   : > { %1586 = vpow2.f32 %v754_v5  ;;  %v766_v7 = vsel %vm603_vm3, %v761_v6, 0 }
 0x46f   : > { %1434 = vmatpush3.bf16.msra.mxu0 %v766_v7 }
 0x470   : > { %1445 = vmatprep.subr.bf16.mxu0 %v1806_v0 }
 0x471   : > { %v859_v13 = vpop.permute.xlu1 %858 }
 0x47b   : > { %v1587_v8 = vpop.eup %1586 }
 0x47c   : > { %v756_v10 = vsel %vm532_vm2, %v1587_v8, 0.0  ;;  %v759_v11 = vpack.c.bf16 %v1587_v8, %v1587_v8 }
 0x47d   : > { %757 = vadd.xlane.f32.xlu1 %v756_v10 }
 0x47e   : > { %1436 = vmatmul.mubr.msk.bf16.vlgmr.msra.gmra.mxu0 %vm532_vm2, %v759_v11 }
 0x47f   : > { %1446 = vmatpush3.bf16.xpose.msra.mxu0 %v866_v12  ;;  %1447 = vmatprep.mubr.msk.bf16.mxu0 %vm1807_vm0, %v1806_v0 }
 0x480   : > { %1457 = vmatprep.subr.bf16.mxu0 %v1806_v0 }
 0x486   : > { %1448 = vmatmul.mubr.msk.bf16.vlgmr.msra.gmra.mxu0 %vm532_vm2, %v859_v13 }
 0x487   : > { %1459 = vmatprep.mubr.msk.bf16.mxu0 %vm1807_vm0, %v1806_v0  ;;  %1458 = vmatpush3.bf16.msra.mxu0 %v975_v56 }
 0x488   : > { %1469 = vmatprep.subr.bf16.mxu0 %v1806_v0 }
 0x48e   : > { %920 = vrot.lane.b32.xlu1 %v2038_v18, %s1812_s21 }
 0x492   : > { %1018 = vrot.lane.b32.xlu1 %v2045_v23, %s1813_s1 }
 0x497   : > { %v690_v14 = vpop.f32.mrf.mxu0 }
 0x498   : > { %v696_v49 = vadd.f32 %v1346_v48, %v690_v14 }
 0x499   : > { %v1425_v15 = vpop.f32.mrf.mxu0 }
 0x49a   : > { %v400_v15 = vld [vmem:[#allocation8 + $0xc] sm:$0xf] }
 0x49b   : > { %v693_v16 = vpop.f32.mrf.mxu0 }
 0x49c   : > { %v1135_v16 = vsel %vm603_vm3, %v400_v15, 0 }
 0x49d   : > { %v1426_v17 = vpop.f32.mrf.mxu0 }
 0x506   : > { %v758_v21 = vpop.xlane.xlu1 %757 }
 0x507   : > { %1588 = vrcp.f32 %v758_v21 }
 0x50a   : > { %v921_v26 = vpop.permute.xlu1 %920 }
 0x50b   : > { %v926_v23 = vsel %vm603_vm3, %v921_v26, 0 }
 0x50e   : > { %v1019_v47 = vpop.permute.xlu1 %1018 }
 0x514   : > { %v1589_v22 = vpop.eup %1588 }
 0x53e   : > { %v802_v24 = vpop.f32.mrf.mxu0 }
 0x53f   : > { %v809_v25 = vmul.f32 %v1589_v22, %v802_v24 }
 0x540   : > { %v1437_v27 = vpop.f32.mrf.mxu0 }
 0x541   : > { %v810_v28 = vpack.c.bf16 %v809_v25, %v809_v25 }
 0x542   : > { %v805_v29 = vpop.f32.mrf.mxu0 }
 0x543   : > { %1442 = vmatmul.mubr.msk.bf16.vlgmr.msra.gmra.mxu1 %vm532_vm2, %v810_v28 }
 0x544   : > { %1452 = vmatpush3.bf16.msra.mxu1 %v926_v23  ;;  %v1438_v30 = vpop.f32.mrf.mxu0  ;;  %1453 = vmatprep.mubr.msk.bf16.mxu1 %vm1807_vm0, %v1806_v0 }
 0x545   : > { %1463 = vmatprep.subr.bf16.mxu1 %v1806_v0 }
 0x546   : > { %v902_v31 = vpop.f32.mrf.mxu0 }
 0x547   : > { %v908_v33 = vmul.f32 0.35355338, %v902_v31 }
 0x548   : > { %v1449_v34 = vpop.f32.mrf.mxu0 }
 0x549   : > { %v909_v35 = vadd.f32 %v908_v33, %v2060_v32 }
 0x54a   : > { %v905_v36 = vpop.f32.mrf.mxu0 }
 0x54b   : > { %v910_v37 = vsel %vm532_vm2, %v909_v35, -inf }
 0x54c   : > { %911 = vmax.xlane.f32.xlu0 %v910_v37  ;;  %v1450_v38 = vpop.f32.mrf.mxu0 }
 0x562   : > { %1020 = vrot.lane.b32.xlu0 %v2038_v18, %s1813_s1 }
 0x5d5   : > { %v912_v39 = vpop.xlane.xlu0 %911 }
 0x5d6   : > { %v913_v40 = vsub.f32 %v909_v35, %v912_v39 }
 0x5d8   : > { %v914_v41 = vmul.f32 1.442695, %v913_v40 }
 0x5d9   : > { %v1021_v43 = vpop.permute.xlu0 %1020 }
 0x5da   : > { %1590 = vpow2.f32 %v914_v41  ;;  %v1026_v46 = vsel %vm532_vm2, %v1021_v43, 0 }
 0x5e7   : > { %v1591_v42 = vpop.eup %1590 }
 0x5e8   : > { %v916_v44 = vsel %vm532_vm2, %v1591_v42, 0.0  ;;  %v919_v45 = vpack.c.bf16 %v1591_v42, %v1591_v42 }
 0x5e9   : > { %917 = vadd.xlane.f32.xlu1 %v916_v44 }
 0x5ea   : > { %1454 = vmatmul.mubr.msk.bf16.vlgmr.msra.gmra.mxu1 %vm532_vm2, %v919_v45 }
 0x5eb   : > { %1464 = vmatpush3.bf16.xpose.msra.mxu1 %v1026_v46  ;;  %1465 = vmatprep.mubr.msk.bf16.mxu1 %vm1807_vm0, %v1806_v0 }
 0x5ec   : > { %1475 = vmatprep.subr.bf16.mxu1 %v1806_v0 }
 0x5f2   : > { %1466 = vmatmul.mubr.msk.bf16.vlgmr.msra.gmra.mxu1 %vm532_vm2, %v1019_v47 }
 0x5f3   : > { %1477 = vmatprep.mubr.msk.bf16.mxu1 %vm1807_vm0, %v1806_v0  ;;  %1476 = vmatpush3.bf16.msra.mxu1 %v1135_v16 }
 0x603   : > { %v851_v50 = vpop.f32.mrf.mxu1 }
 0x604   : > { %v857_v51 = vadd.f32 %v851_v50, %v696_v49 }
 0x605   : > { %v1443_v52 = vpop.f32.mrf.mxu1 }
 0x607   : > { %v854_v53 = vpop.f32.mrf.mxu1 }
 0x609   : > { %v1444_v54 = vpop.f32.mrf.mxu1 }
 0x672   : > { %v918_v57 = vpop.xlane.xlu1 %917 }
 0x673   : > { %1592 = vrcp.f32 %v918_v57 }
 0x680   : > { %v1593_v58 = vpop.eup %1592 }
 0x6aa   : > { %v962_v59 = vpop.f32.mrf.mxu1 }
 0x6ab   : > { %v969_v60 = vmul.f32 %v1593_v58, %v962_v59 }
 0x6ac   : > { %v1455_v61 = vpop.f32.mrf.mxu1 }
 0x6ad   : > { %v970_v62 = vpack.c.bf16 %v969_v60, %v969_v60 }
 0x6ae   : > { %v965_v63 = vpop.f32.mrf.mxu1 }
 0x6af   : > { %1460 = vmatmul.mubr.msk.bf16.vlgmr.msra.gmra.mxu0 %vm532_vm2, %v970_v62 }
 0x6b0   : > { %v1456_v1 = vpop.f32.mrf.mxu1  ;;  %1471 = vmatprep.mubr.msk.bf16.mxu0 %vm1807_vm0, %v1806_v0 }
 0x6b2   : > { %v1062_v2 = vpop.f32.mrf.mxu1 }
 0x6b3   : > { %v1068_v3 = vmul.f32 0.35355338, %v1062_v2 }
 0x6b4   : > { %v1467_v4 = vpop.f32.mrf.mxu1 }
 0x6b5   : > { %v1069_v5 = vadd.f32 %v1068_v3, %v2060_v32 }
 0x6b6   : > { %v1065_v6 = vpop.f32.mrf.mxu1 }
 0x6b7   : > { %v1070_v7 = vsel %vm532_vm2, %v1069_v5, -inf }
 0x6b8   : > { %1071 = vmax.xlane.f32.xlu0 %v1070_v7  ;;  %v1468_v8 = vpop.f32.mrf.mxu1 }
 0x6ce   : > { %1080 = vrot.lane.b32.xlu0 %v2038_v18, %s1814_s11 }
 0x741   : > { %v1072_v9 = vpop.xlane.xlu0 %1071 }
 0x742   : > { %v1073_v10 = vsub.f32 %v1069_v5, %v1072_v9 }
 0x744   : > { %v1074_v11 = vmul.f32 1.442695, %v1073_v10 }
 0x745   : > { %v1081_v12 = vpop.permute.xlu0 %1080 }
 0x746   : > { %1594 = vpow2.f32 %v1074_v11  ;;  %v1086_v0 = vsel %vm603_vm3, %v1081_v12, 0 }
 0x747   : > { %1470 = vmatpush3.bf16.msra.mxu0 %v1086_v0 }
 0x753   : > { %v1595_v13 = vpop.eup %1594 }
 0x754   : > { %v1076_v14 = vsel %vm532_vm2, %v1595_v13, 0.0  ;;  %v1079_v32 = vpack.c.bf16 %v1595_v13, %v1595_v13 }
 0x755   : > { %1077 = vadd.xlane.f32.xlu1 %v1076_v14 }
 0x756   : > { %1472 = vmatmul.mubr.msk.bf16.vlgmr.msra.gmra.mxu0 %vm532_vm2, %v1079_v32 }
 0x76f   : > { %v1011_v18 = vpop.f32.mrf.mxu0 }
 0x770   : > { %v1017_v17 = vadd.f32 %v1011_v18, %v857_v51 }
 0x771   : > { %v1461_v19 = vpop.f32.mrf.mxu0 }
 0x773   : > { %v1014_v20 = vpop.f32.mrf.mxu0 }
 0x775   : > { %v1462_v21 = vpop.f32.mrf.mxu0 }
 0x7de   : > { %v1078_v22 = vpop.xlane.xlu1 %1077 }
 0x7df   : > { %1596 = vrcp.f32 %v1078_v22 }
 0x7ec   : > { %v1597_v24 = vpop.eup %1596 }
 0x816   : > { %v1122_v25 = vpop.f32.mrf.mxu0 }
 0x817   : > { %v1129_v26 = vmul.f32 %v1597_v24, %v1122_v25 }
 0x818   : > { %v1473_v27 = vpop.f32.mrf.mxu0 }
 0x819   : > { %v1130_v28 = vpack.c.bf16 %v1129_v26, %v1129_v26 }
 0x81a   : > { %v1125_v29 = vpop.f32.mrf.mxu0 }
 0x81b   : > { %1478 = vmatmul.mubr.msk.bf16.vlgmr.msra.gmra.mxu1 %vm532_vm2, %v1130_v28 }
 0x81c   : > { %v1474_v23 = vpop.f32.mrf.mxu0 }
 0x8db   : > { %v1171_v30 = vpop.f32.mrf.mxu1 }
 0x8dc   : > { %v1177_v31 = vadd.f32 %v1171_v30, %v1017_v17 }
 0x8dd   : > { %v1479_v33 = vpop.f32.mrf.mxu1 }
 0x8de   : > { %1178 = vst.msk [vmem:[%s387_s9] sm:$0xff] %vm424_vm1, %v1177_v31 }
 0x8df   : > { %v1174_v34 = vpop.f32.mrf.mxu1 }
 0x8e0   : > { %1719 = shalt.err (!%p1716_p2)
}
 0x8e1   : > { %s1720_s0 = scalar_lea.hbm %s2138_s5, 128  ;;  %s1724_s21 = scalar_lea.hbm %s2194_s7, 256 }
 0x8e2   : > { %p1721_p6 = scmp.ne.s32.totalorder %s2138_s5, %s1720_s0  ;;  %p1725_p0 = scmp.lt.s32.totalorder %s2138_s5, %s2194_s7 }
 0x8e3   : > { %p1726_p12 = scmp.lt.s32.totalorder %s1724_s21, %s1720_s0 }
 0x8e4   : > { %p1722_p8 = pnand %p1721_p6, %p1947_p9 }
 0x8e5   : > { %p1727_p4 = por %p1726_p12, %p1725_p0 }
 0x8e6   : > { %p1723_p11 = pneg %p1722_p8 }
 0x8e8   : > { %p1728_p3 = pnand %p1727_p4, %p1723_p11 }
 0x8ea   : > { %1731 = shalt.err (!%p1728_p3)
}
 0x8eb   : > { %1493 = dma.vmem_to_hbm [thread:$0]  (%p1947_p9), %s2140_s30, 128, %s2138_s5, %s1180_s17   ;;  %v1480_v35 = vpop.f32.mrf.mxu1 }
 0x8ec PF: > { %s1206_s3 = sand.u32 1, %s1778_s24   ;;  %p2217_p7 = scmp.ne.s32.totalorder %s2202_s10, 0 }
 0x8ed   : > { %p2218_p13 = scmp.ge.s32.totalorder %s1798_s29, 2  ;;  %s1207_s11 = scalar_lea.sflag [#allocation4], %s1206_s3 }
 0x8ef   : > { %p1510_p5 = pnand %p2218_p13, %p2217_p7 }
 0x8f1   : > { %p1511_p10 = pneg %p1510_p5 }
 0x8f3   : > { %1773 = dma.done.wait (%p1511_p10), %s1207_s11, 128  }
 0x8f4   : > { %1775 = vsyncadd (%p1511_p10), %s1207_s11, 4294967168  ;;  %s27_s29 = sadd.s32 1, %s1798_s29   ;;  %s2219_s14 = sld [smem:[#allocation16_spill]] }
 0x8f5   : > { %p24_p1 = scmp.ge.s32.totalorder %s27_s29, 4   ;;  %s2220_s24 = smov %s1782_s25 }
 0x8f6   : > { %s2221_s25 = smov %s1786_s26  ;;  %s2222_s26 = smov %s1956_s19 }
 0x8f7   : > { %s2223_s27 = smov %s1794_s28  ;;  %26 = sbr.rel (!%p24_p1) target bundleno = 14 (0xe), region = 117 }
 0x8fa   : > { %s2224_s28 = smov %s2219_s14 }
 0x8fc   :  { %1212 = vsyncpa [#allocation3], 1 }
 0x8fd   :  { %1214 = vsyncpa [#allocation3 + $0x1], 1 }
 0x8fe   :  { %1215 = vsyncpa [#allocation6], 1 }
 0x8ff   :  { %1217 = vsyncpa [#allocation6 + $0x1], 1 }
 0x900   :  { %1218 = vsyncpa [#allocation9], 1 }
 0x901   :  { %1219 = vsyncpa [#allocation4], 1 }
 0x902   :  { %1221 = vsyncpa [#allocation4 + $0x1], 1 }

</bundles_post_ra>
